<compile_context>
chip_gen: v7x
topology: tpu7x:2x2x1
jax: 0.10.0
libtpu: 0.0.40
codegen_flags: <defaults>
</compile_context>

<pallas_src>
import functools

import jax
import jax.numpy as jnp
from jax import lax
from jax.experimental import pallas as pl
from jax.experimental.pallas import tpu as pltpu


# Kernel-side sublane layout of the gathered prediction slab (channel -> row):
#   row 0: ch 0 (bin1 class-0 logit)   row 4: ch 1 (bin1 class-1 logit)
#   row 1: ch 4 (bin2 class-0 logit)   row 5: ch 5 (bin2 class-1 logit)
#   row 2: ch 2 (sin1 prediction)      row 6: ch 3 (cos1 prediction)
#   row 3: ch 6 (sin2 prediction)      row 7: ch 7 (cos2 prediction)
# Every CE logit pair is 4 sublanes apart, so the partner operand is a
# direction-independent "roll by 4" (implemented as a 2-piece concat).
_CHAN_PERM = (0, 4, 2, 6, 1, 5, 3, 7)

# Matching aux/target slab rows (packed once in the wrapper, f32):
#   row 0: bin1   row 1: bin2   row 2: sin(res1)  row 3: sin(res2)
#   row 4: mask   row 5: 0      row 6: cos(res1)  row 7: cos(res2)


def _tile_contrib(x, aux, col0, n_valid):
    """Per-lane loss contributions on full (8, T) vregs.

    Row sums of the returned slab give
      [sum_ce1, sum_ce2, sum_sl_sin1, sum_sl_sin2, n1, n2, sum_sl_cos1, sum_sl_cos2].
    Padded lanes (col >= n_valid) contribute exactly zero.
    """
    R, T = x.shape
    f32 = jnp.float32

    rows = lax.broadcasted_iota(jnp.int32, (R, T), 0)
    cols = col0 + lax.broadcasted_iota(jnp.int32, (R, T), 1)
    valid = (cols < n_valid).astype(f32)                       # 0 on padded lanes

    is_ce = rows < 2                                           # rows 0,1
    is_res = (rows == 2) | (rows == 3) | (rows == 6) | (rows == 7)
    is_g1 = (rows == 0) | (rows == 2) | (rows == 4) | (rows == 6)

    bin1_b = jnp.broadcast_to(aux[0:1, :], (R, T))
    bin2_b = jnp.broadcast_to(aux[1:2, :], (R, T))
    msk_b = jnp.broadcast_to(aux[4:5, :], (R, T))
    bin_b = jnp.where(is_g1, bin1_b, bin2_b)                   # bin1 on group-1 rows

    # ---- 2-class cross entropy on mask-scaled logits (only rows 0,1 are kept).
    xm = x * msk_b                                             # logit rows masked; other rows unused by CE
    xr = jnp.concatenate([xm[4:8, :], xm[0:4, :]], axis=0)     # pair partner (row r+4)
    lse = jnp.maximum(xm, xr) + jnp.log(1.0 + jnp.exp(-jnp.abs(xm - xr)))  # 1 exp + 1 log
    picked = jnp.where(bin_b > 0.5, xr, xm)                    # class-1 logit lives in the partner row
    ce = lse - picked

    # ---- smooth-L1 residuals (rows 2,3,6,7; aux already holds sin/cos targets).
    d = x - aux
    ad = jnp.abs(d)
    sl = jnp.where(ad < 1.0, 0.5 * d * d, ad - 0.5)

    # residual-row selector: rotbin != 0 (matches torch's .nonzero()), plus lane validity
    sel = (bin_b != 0.0).astype(f32) * valid

    # rows 0,1: CE;  rows 2,3,6,7: smooth-L1 * selector;  rows 4,5: selector counts (n1, n2)
    return jnp.where(is_ce, ce * valid, jnp.where(is_res, sl * sel, sel))


def _binrot_kernel_single(x_ref, aux_ref, out_ref, *, n_valid):
    """Whole problem in one grid step: no scratch, no init/finalize."""
    x = x_ref[...].astype(jnp.float32)                         # whole-block upcast (bf16-safe)
    contrib = _tile_contrib(x, aux_ref[...], 0, n_valid)
    rowsum = jnp.sum(contrib, axis=1, keepdims=True)           # single cross-lane reduce, (8, 1)
    out_ref[...] = jnp.broadcast_to(rowsum, out_ref.shape)     # lane-dense (8, 128) store


def _binrot_kernel_tiled(x_ref, aux_ref, out_ref, acc_ref, *, n_valid):
    """Lane-tiled accumulation path for large N."""
    i = pl.program_id(0)

    @pl.when(i == 0)
    def _():
        acc_ref[...] = jnp.zeros_like(acc_ref)

    x = x_ref[...].astype(jnp.float32)
    tile = x.shape[1]
    # one full-block accumulator update per grid step
    acc_ref[...] += _tile_contrib(x, aux_ref[...], i * tile, n_valid)

    @pl.when(i == pl.num_programs(0) - 1)
    def _():
        rowsum = jnp.sum(acc_ref[...], axis=1, keepdims=True)
        out_ref[...] = jnp.broadcast_to(rowsum, out_ref.shape)


def bin_rot_loss_pallas(output, mask, ind, rotbin, rotres, *,
                        max_single_tile=4096, tile_n=1024):
    """Pallas port of BinRotLoss.forward(output, mask, ind, rotbin, rotres)."""
    B, C, H, W = output.shape
    if C != 8:
        raise ValueError("BinRotLoss expects an 8-channel rotation head")
    K = ind.shape[1]
    N = B * K
    f32 = jnp.float32

    # ---- _tranpose_and_gather_feat without materializing the NHWC transpose:
    # gather K positions per (b, c) straight from the (B, C, H*W) view.
    out_flat = output.reshape(B, C, H * W)
    idx = jnp.broadcast_to(ind.astype(jnp.int32)[:, None, :], (B, C, K))
    pred = jnp.take_along_axis(out_flat, idx, axis=2)          # (B, 8, K), native dtype
    pred = jnp.transpose(pred, (1, 0, 2)).reshape(C, N)        # (8, N), col = b*K + k
    pred = jnp.take(pred, jnp.asarray(_CHAN_PERM), axis=0)     # kernel sublane layout

    # ---- aux slab: targets aligned row-for-row with the prediction layout
    tb = rotbin.reshape(N, 2).astype(f32)
    tr = rotres.reshape(N, 2).astype(f32)
    mk = mask.reshape(N).astype(f32)
    aux = jnp.stack(
        [tb[:, 0], tb[:, 1],
         jnp.sin(tr[:, 0]), jnp.sin(tr[:, 1]),
         mk, jnp.zeros_like(mk),
         jnp.cos(tr[:, 0]), jnp.cos(tr[:, 1])], axis=0)        # (8, N) f32

    # ---- tiling: single grid step for typical N; lane-tiled accumulation otherwise
    lane = 128
    n128 = ((N + lane - 1) // lane) * lane
    if n128 <= max_single_tile:
        tile, n_pad, grid, single = n128, n128, (1,), True
    else:
        tile = max(lane, (tile_n // lane) * lane)
        n_pad = ((N + tile - 1) // tile) * tile
        grid, single = (n_pad // tile,), False

    pred = jnp.pad(pred, ((0, 0), (0, n_pad - N)))             # padded lanes masked in-kernel
    aux = jnp.pad(aux, ((0, 0), (0, n_pad - N)))

    kernel = functools.partial(
        _binrot_kernel_single if single else _binrot_kernel_tiled, n_valid=N)
    scratch = [] if single else [pltpu.VMEM((8, tile), jnp.float32)]

    sums = pl.pallas_call(
        kernel,
        out_shape=jax.ShapeDtypeStruct((8, 128), jnp.float32),
        grid_spec=pltpu.PrefetchScalarGridSpec(
            num_scalar_prefetch=0,
            grid=grid,
            in_specs=[pl.BlockSpec((8, tile), lambda i: (0, i)),
                      pl.BlockSpec((8, tile), lambda i: (0, i))],
            out_specs=pl.BlockSpec((8, 128), lambda i: (0, 0)),
            scratch_shapes=scratch,
        ),
        compiler_params=pltpu.CompilerParams(
            dimension_semantics=("arbitrary",)),
    )(pred, aux)

    s = sums[:, 0]                                             # 8 partial sums
    n_rows = jnp.asarray(N, f32)
    loss_bin1 = s[0] / n_rows
    loss_bin2 = s[1] / n_rows
    n1, n2 = s[4], s[5]
    # matches torch's `if nonzero > 0:` branches (0 contribution when empty)
    loss_res1 = jnp.where(n1 > 0, (s[2] + s[6]) / jnp.maximum(n1, 1.0), 0.0)
    loss_res2 = jnp.where(n2 > 0, (s[3] + s[7]) / jnp.maximum(n2, 1.0), 0.0)
    return loss_bin1 + loss_bin2 + loss_res1 + loss_res2


def _reference_bin_rot_loss(output, mask, ind, rotbin, rotres):
    """Pure-JAX replica of the PyTorch BinRotLoss forward, for verification."""
    B, C, H, W = output.shape
    K = ind.shape[1]
    feat = jnp.transpose(output, (0, 2, 3, 1)).reshape(B, H * W, C)
    idx = jnp.broadcast_to(ind.astype(jnp.int32)[..., None], (B, K, C))
    pred = jnp.take_along_axis(feat, idx, axis=1)              # (B, K, 8)

    out = pred.reshape(-1, 8)
    tb = rotbin.reshape(-1, 2)
    tr = rotres.reshape(-1, 2).astype(jnp.float32)
    mk = mask.reshape(-1, 1).astype(jnp.float32)

    def ce_mean(logits, tgt):
        logits = logits * mk
        lp = jax.nn.log_softmax(logits, axis=-1)
        nll = -jnp.take_along_axis(lp, tgt[:, None].astype(jnp.int32), axis=-1)[:, 0]
        return jnp.mean(nll)

    def smooth_l1(p, t):
        d = p - t
        ad = jnp.abs(d)
        return jnp.where(ad < 1.0, 0.5 * d * d, ad - 0.5)

    loss_bin1 = ce_mean(out[:, 0:2], tb[:, 0])
    loss_bin2 = ce_mean(out[:, 4:6], tb[:, 1])

    sel1 = tb[:, 0] != 0
    n1 = jnp.sum(sel1)
    ls1 = jnp.sum(jnp.where(sel1, smooth_l1(out[:, 2], jnp.sin(tr[:, 0])), 0.0))
    lc1 = jnp.sum(jnp.where(sel1, smooth_l1(out[:, 3], jnp.cos(tr[:, 0])), 0.0))
    loss_res1 = jnp.where(n1 > 0, (ls1 + lc1) / jnp.maximum(n1, 1), 0.0)

    sel2 = tb[:, 1] != 0
    n2 = jnp.sum(sel2)
    ls2 = jnp.sum(jnp.where(sel2, smooth_l1(out[:, 6], jnp.sin(tr[:, 1])), 0.0))
    lc2 = jnp.sum(jnp.where(sel2, smooth_l1(out[:, 7], jnp.cos(tr[:, 1])), 0.0))
    loss_res2 = jnp.where(n2 > 0, (ls2 + lc2) / jnp.maximum(n2, 1), 0.0)

    return loss_bin1 + loss_bin2 + loss_res1 + loss_res2


if __name__ == "__main__":
    key = jax.random.PRNGKey(0)
    k1, k2, k3, k4, k5 = jax.random.split(key, 5)

    B, C, H, W, K = 2, 8, 16, 16, 8
    output = jax.random.normal(k1, (B, C, H, W), jnp.float32)
    ind = jax.random.randint(k2, (B, K), 0, H * W).astype(jnp.int32)
    mask = (jax.random.uniform(k3, (B, K)) < 0.7).astype(jnp.float32)
    rotbin = jax.random.randint(k4, (B, K, 2), 0, 2).astype(jnp.int32)
    rotres = jax.random.uniform(k5, (B, K, 2), jnp.float32, -3.14159, 3.14159)

    fn = jax.jit(bin_rot_loss_pallas, static_argnames=("max_single_tile", "tile_n"))

    # single-grid-step path (typical small N)
    loss = jax.block_until_ready(fn(output, mask, ind, rotbin, rotres))
    ref = _reference_bin_rot_loss(output, mask, ind, rotbin, rotres)
    assert jnp.allclose(loss, ref, rtol=1e-5, atol=1e-5), (loss, ref)

    # lane-tiled accumulation path, still at small shapes (forced small tile)
    K2 = 256
    ind2 = jax.random.randint(k2, (B, K2), 0, H * W).astype(jnp.int32)
    mask2 = (jax.random.uniform(k3, (B, K2)) < 0.7).astype(jnp.float32)
    rotbin2 = jax.random.randint(k4, (B, K2, 2), 0, 2).astype(jnp.int32)
    rotres2 = jax.random.uniform(k5, (B, K2, 2), jnp.float32, -3.14159, 3.14159)
    loss2 = jax.block_until_ready(
        fn(output, mask2, ind2, rotbin2, rotres2, max_single_tile=128, tile_n=128))
    ref2 = _reference_bin_rot_loss(output, mask2, ind2, rotbin2, rotres2)
    assert jnp.allclose(loss2, ref2, rtol=1e-5, atol=1e-5), (loss2, ref2)

    print("KERNEL_OK")
</pallas_src>

<mosaic_0001>
module attributes {stable_mosaic.version = 11 : i64} {
  func.func @_binrot_kernel_single(%arg0: i32, %arg1: memref<8x128xf32, #tpu.memory_space<vmem>>, %arg2: memref<8x128xf32, #tpu.memory_space<vmem>>, %arg3: memref<8x128xf32, #tpu.memory_space<vmem>>) attributes {dimension_semantics = [#tpu.dimension_semantics<arbitrary>], iteration_bounds = array<i64: 1>, scalar_prefetch = 0 : i64, scratch_operands = 0 : i64, tpu.core_type = #tpu.core_type<tc>, window_params = [{transform_indices = @transform_0, window_bounds = array<i64: 8, 128>}, {transform_indices = @transform_1, window_bounds = array<i64: 8, 128>}, {pipeline_mode = #tpu.pipeline_mode<synchronous>, transform_indices = @transform_2, window_bounds = array<i64: 8, 128>}]} {
    %c0 = arith.constant 0 : index
    %c0_0 = arith.constant 0 : index
    %0 = vector.load %arg1[%c0, %c0_0] : memref<8x128xf32, #tpu.memory_space<vmem>>, vector<8x128xf32>
    %c0_1 = arith.constant 0 : index
    %c0_2 = arith.constant 0 : index
    %1 = vector.load %arg2[%c0_1, %c0_2] : memref<8x128xf32, #tpu.memory_space<vmem>>, vector<8x128xf32>
    %2 = tpu.iota {dimensions = array<i32: 0>} : vector<8x128xi32>
    %3 = tpu.iota {dimensions = array<i32: 1>} : vector<8x128xi32>
    %c0_i32 = arith.constant 0 : i32
    %4 = vector.broadcast %c0_i32 : i32 to vector<8x128xi32>
    %5 = arith.addi %4, %3 : vector<8x128xi32>
    %c16_i32 = arith.constant 16 : i32
    %6 = vector.broadcast %c16_i32 : i32 to vector<8x128xi32>
    %7 = arith.cmpi slt, %5, %6 : vector<8x128xi32>
    %8 = arith.extui %7 : vector<8x128xi1> to vector<8x128xi32>
    %9 = arith.sitofp %8 : vector<8x128xi32> to vector<8x128xf32>
    %c2_i32 = arith.constant 2 : i32
    %10 = vector.broadcast %c2_i32 : i32 to vector<8x128xi32>
    %11 = arith.cmpi slt, %2, %10 : vector<8x128xi32>
    %c2_i32_3 = arith.constant 2 : i32
    %12 = vector.broadcast %c2_i32_3 : i32 to vector<8x128xi32>
    %13 = arith.cmpi eq, %2, %12 : vector<8x128xi32>
    %c3_i32 = arith.constant 3 : i32
    %14 = vector.broadcast %c3_i32 : i32 to vector<8x128xi32>
    %15 = arith.cmpi eq, %2, %14 : vector<8x128xi32>
    %16 = arith.ori %13, %15 : vector<8x128xi1>
    %c6_i32 = arith.constant 6 : i32
    %17 = vector.broadcast %c6_i32 : i32 to vector<8x128xi32>
    %18 = arith.cmpi eq, %2, %17 : vector<8x128xi32>
    %19 = arith.ori %16, %18 : vector<8x128xi1>
    %c7_i32 = arith.constant 7 : i32
    %20 = vector.broadcast %c7_i32 : i32 to vector<8x128xi32>
    %21 = arith.cmpi eq, %2, %20 : vector<8x128xi32>
    %22 = arith.ori %19, %21 : vector<8x128xi1>
    %c0_i32_4 = arith.constant 0 : i32
    %23 = vector.broadcast %c0_i32_4 : i32 to vector<8x128xi32>
    %24 = arith.cmpi eq, %2, %23 : vector<8x128xi32>
    %c2_i32_5 = arith.constant 2 : i32
    %25 = vector.broadcast %c2_i32_5 : i32 to vector<8x128xi32>
    %26 = arith.cmpi eq, %2, %25 : vector<8x128xi32>
    %27 = arith.ori %24, %26 : vector<8x128xi1>
    %c4_i32 = arith.constant 4 : i32
    %28 = vector.broadcast %c4_i32 : i32 to vector<8x128xi32>
    %29 = arith.cmpi eq, %2, %28 : vector<8x128xi32>
    %30 = arith.ori %27, %29 : vector<8x128xi1>
    %c6_i32_6 = arith.constant 6 : i32
    %31 = vector.broadcast %c6_i32_6 : i32 to vector<8x128xi32>
    %32 = arith.cmpi eq, %2, %31 : vector<8x128xi32>
    %33 = arith.ori %30, %32 : vector<8x128xi1>
    %34 = vector.extract_strided_slice %1 {offsets = [0, 0], sizes = [1, 128], strides = [1, 1]} : vector<8x128xf32> to vector<1x128xf32>
    %35 = vector.shape_cast %34 : vector<1x128xf32> to vector<1x128xf32>
    %36 = vector.broadcast %35 : vector<1x128xf32> to vector<8x128xf32>
    %37 = vector.extract_strided_slice %1 {offsets = [1, 0], sizes = [1, 128], strides = [1, 1]} : vector<8x128xf32> to vector<1x128xf32>
    %38 = vector.shape_cast %37 : vector<1x128xf32> to vector<1x128xf32>
    %39 = vector.broadcast %38 : vector<1x128xf32> to vector<8x128xf32>
    %40 = vector.extract_strided_slice %1 {offsets = [4, 0], sizes = [1, 128], strides = [1, 1]} : vector<8x128xf32> to vector<1x128xf32>
    %41 = vector.shape_cast %40 : vector<1x128xf32> to vector<1x128xf32>
    %42 = vector.broadcast %41 : vector<1x128xf32> to vector<8x128xf32>
    %43 = arith.select %33, %36, %39 : vector<8x128xi1>, vector<8x128xf32>
    %44 = arith.mulf %0, %42 : vector<8x128xf32>
    %45 = vector.extract_strided_slice %44 {offsets = [4, 0], sizes = [4, 128], strides = [1, 1]} : vector<8x128xf32> to vector<4x128xf32>
    %46 = vector.extract_strided_slice %44 {offsets = [0, 0], sizes = [4, 128], strides = [1, 1]} : vector<8x128xf32> to vector<4x128xf32>
    %47 = tpu.concatenate %45, %46 in 0 : vector<4x128xf32>, vector<4x128xf32> -> vector<8x128xf32>
    %48 = arith.maximumf %44, %47 : vector<8x128xf32>
    %49 = arith.subf %44, %47 : vector<8x128xf32>
    %50 = math.absf %49 : vector<8x128xf32>
    %cst = arith.constant 0.000000e+00 : f32
    %51 = vector.broadcast %cst : f32 to vector<8x128xf32>
    %52 = arith.subf %51, %50 : vector<8x128xf32>
    %53 = math.exp %52 : vector<8x128xf32>
    %cst_7 = arith.constant 1.000000e+00 : f32
    %54 = vector.broadcast %cst_7 : f32 to vector<8x128xf32>
    %55 = arith.addf %54, %53 : vector<8x128xf32>
    %56 = math.log %55 : vector<8x128xf32>
    %57 = arith.addf %48, %56 : vector<8x128xf32>
    %cst_8 = arith.constant 5.000000e-01 : f32
    %58 = vector.broadcast %cst_8 : f32 to vector<8x128xf32>
    %59 = arith.cmpf ogt, %43, %58 : vector<8x128xf32>
    %60 = arith.select %59, %47, %44 : vector<8x128xi1>, vector<8x128xf32>
    %61 = arith.subf %57, %60 : vector<8x128xf32>
    %62 = arith.subf %0, %1 : vector<8x128xf32>
    %63 = math.absf %62 : vector<8x128xf32>
    %cst_9 = arith.constant 1.000000e+00 : f32
    %64 = vector.broadcast %cst_9 : f32 to vector<8x128xf32>
    %65 = arith.cmpf olt, %63, %64 : vector<8x128xf32>
    %cst_10 = arith.constant 5.000000e-01 : f32
    %66 = vector.broadcast %cst_10 : f32 to vector<8x128xf32>
    %67 = arith.mulf %66, %62 : vector<8x128xf32>
    %68 = arith.mulf %67, %62 : vector<8x128xf32>
    %cst_11 = arith.constant 5.000000e-01 : f32
    %69 = vector.broadcast %cst_11 : f32 to vector<8x128xf32>
    %70 = arith.subf %63, %69 : vector<8x128xf32>
    %71 = arith.select %65, %68, %70 : vector<8x128xi1>, vector<8x128xf32>
    %cst_12 = arith.constant 0.000000e+00 : f32
    %72 = vector.broadcast %cst_12 : f32 to vector<8x128xf32>
    %73 = arith.cmpf one, %43, %72 : vector<8x128xf32>
    %74 = arith.extui %73 : vector<8x128xi1> to vector<8x128xi32>
    %75 = arith.sitofp %74 : vector<8x128xi32> to vector<8x128xf32>
    %76 = arith.mulf %75, %9 : vector<8x128xf32>
    %77 = arith.mulf %61, %9 : vector<8x128xf32>
    %78 = arith.mulf %71, %76 : vector<8x128xf32>
    %79 = arith.select %22, %78, %76 : vector<8x128xi1>, vector<8x128xf32>
    %80 = arith.select %11, %77, %79 : vector<8x128xi1>, vector<8x128xf32>
    %cst_13 = arith.constant dense<0.000000e+00> : vector<8xf32>
    %81 = vector.multi_reduction <add>, %80, %cst_13 [1] : vector<8x128xf32> to vector<8xf32>
    %82 = vector.shape_cast %81 : vector<8xf32> to vector<8x1xf32>
    %83 = vector.shape_cast %82 : vector<8x1xf32> to vector<8x1xf32>
    %84 = vector.broadcast %83 : vector<8x1xf32> to vector<8x128xf32>
    %c0_14 = arith.constant 0 : index
    %c0_15 = arith.constant 0 : index
    %85 = vector.load %arg3[%c0_14, %c0_15] : memref<8x128xf32, #tpu.memory_space<vmem>>, vector<8x128xf32>
    tpu.vector_store %arg3[%c0_14, %c0_15], %84 {strides = array<i32>} : memref<8x128xf32, #tpu.memory_space<vmem>>, vector<8x128xf32>,
    return
  }
  func.func @transform_0(%arg0: i32) -> (i32, i32) {
    %c0_i32 = arith.constant 0 : i32
    %c0_i32_0 = arith.constant 0 : i32
    return %c0_i32, %arg0 : i32, i32
  }
  func.func @transform_1(%arg0: i32) -> (i32, i32) {
    %c0_i32 = arith.constant 0 : i32
    %c0_i32_0 = arith.constant 0 : i32
    return %c0_i32, %arg0 : i32, i32
  }
  func.func @transform_2(%arg0: i32) -> (i32, i32) {
    %c0_i32 = arith.constant 0 : i32
    %c0_i32_0 = arith.constant 0 : i32
    %c0_i32_1 = arith.constant 0 : i32
    return %c0_i32, %c0_i32_0 : i32, i32
  }
}

</mosaic_0001>

<bundles_post_ra>
// kernel: bin_rot_loss_pallas.1
= control target key start
LH: loop header
LB: loop body
LE: loop exit
PB: predicated region body
PF: predicated region fallthrough
CT: control target
= control target key end

     0   :  { %v13_v0 = vlaneseq  ;;  %v95_v23 = vmov 0.0   ;;  %s124_s1 = inlined_call_operand.vmem [shape: f32[8,128], index: 1, kind: input, shape index: {}]   ;;  %s125_s0 = inlined_call_operand.vmem [shape: f32[8,128], index: 0, kind: input, shape index: {}]   ;;  %s126_s2 = inlined_call_operand.vmem [shape: f32[8,128], index: 2, kind: output, shape index: {}]  }
   0x1   :  { %v12_v2 = vld [vmem:[%s124_s1] sm:$0xff] }
   0x2   :  { %v14_v1 = vshrl.u32 %v13_v0, 7  ;;  %v11_v4 = vld [vmem:[%s125_s0] sm:$0xff]  ;;  %v16_v18 = vand.u32 127, %v13_v0 }
   0x3   :  { %v65_v17 = vsub.f32 %v11_v4, %v12_v2 }
   0x4   :  { %v43_v3 = vsub.s32 4, %v14_v1  ;;  %vm21_vm0 = vcmp.eq.s32.totalorder %v14_v1, 2  ;;  %vm28_vm1 = vcmp.eq.s32.totalorder %v14_v1, 0  ;;  %vm30_vm3 = vcmp.eq.s32.totalorder %v14_v1, 4 }
   0x5   :  { %vm29_vm2 = vmor %vm28_vm1, %vm21_vm0  ;;  %v35_v12 = vsub.s32 0, %v14_v1  ;;  %v39_v13 = vsub.s32 1, %v14_v1  ;;  %vm24_vm4 = vcmp.eq.s32.totalorder %v14_v1, 6  ;;  %v66_v21 = vand.u32 2147483647, %v65_v17 }
   0x6   :  { %v44_v5 = vrot.slane %v12_v2, %v43_v3  ;;  %vm31_vm5 = vmor %vm29_vm2, %vm30_vm3  ;;  %v68_v22 = vmul.f32 0.5, %v65_v17  ;;  %vm17_vm7 = vcmp.lt.s32.totalorder %v16_v18, 16  ;;  %vm22_vm9 = vcmp.eq.s32.totalorder %v14_v1, 3 }
   0x7   :  { %v36_v14 = vrot.slane %v12_v2, %v35_v12  ;;  %v40_v15 = vrot.slane %v12_v2, %v39_v13  ;;  %vm32_vm6 = vmor %vm31_vm5, %vm24_vm4  ;;  %v87_v24 = vsel %vm17_vm7, 1.0, %v95_v23  ;;  %v88_v26 = vadd.f32 -0.5, %v66_v21 }
   0x8   :  { %v46_v6 = vmul.f32 %v44_v5, %v11_v4  ;;  %v69_v25 = vmul.f32 %v68_v22, %v65_v17  ;;  %vm67_vm10 = vcmp.lt.f32.partialorder %v66_v21, 1.0  ;;  %vm23_vm11 = vmor %vm21_vm0, %vm22_vm9  ;;  %vm26_vm14 = vcmp.eq.s32.totalorder %v14_v1, 7 }
   0x9   :  { %v45_v20 = vsel %vm32_vm6, %v36_v14, %v40_v15  ;;  %vm25_vm13 = vmor %vm23_vm11, %vm24_vm4  ;;  %vm20_vm1 = vcmp.lt.s32.totalorder %v14_v1, 2 }
   0xa   :  { %v48_v7 = vrot.slane %v46_v6, 4  ;;  %vm72_vm8 = vcmp.ne.f32.partialorder %v45_v20, 0.0  ;;  %vm62_vm12 = vcmp.gt.f32.partialorder %v45_v20, 0.5  ;;  %v71_v30 = vsel %vm67_vm10, %v69_v25, %v88_v26  ;;  %vm27_vm15 = vmor %vm25_vm13, %vm26_vm14 }
   0xb   :  { %v89_v27 = vsel %vm72_vm8, 1.0, %v95_v23 }
   0xc   :  { %v53_v8 = vsub.f32 %v46_v6, %v48_v7  ;;  %v75_v28 = vmul.f32 %v89_v27, %v87_v24  ;;  %v52_v29 = vmax.f32 %v46_v6, %v48_v7  ;;  %v63_v33 = vsel %vm62_vm12, %v48_v7, %v46_v6 }
   0xe   :  { %v54_v9 = vand.u32 2147483647, %v53_v8  ;;  %v77_v34 = vmul.f32 %v75_v28, %v71_v30 }
  0x10   :  { %v55_v10 = vsub.f32 0.0, %v54_v9  ;;  %v78_v37 = vsel %vm27_vm15, %v77_v34, %v75_v28 }
  0x12   :  { %v56_v11 = vmul.f32 1.442695, %v55_v10 }
  0x14   :  { %91 = vpow2.f32 %v56_v11 }
  0x1e   :  { %v92_v16 = vpop.eup %91 }
  0x1f   :  { %v58_v19 = vadd.f32 1.0, %v92_v16 }
  0x21   :  { %93 = vlog2.f32 %v58_v19 }
  0x2b   :  { %v94_v31 = vpop.eup %93 }
  0x2c   :  { %v60_v32 = vmul.f32 0.6931472, %v94_v31 }
  0x2e   :  { %v61_v35 = vadd.f32 %v60_v32, %v52_v29 }
  0x30   :  { %v64_v36 = vsub.f32 %v61_v35, %v63_v33 }
  0x32   :  { %v76_v38 = vmul.f32 %v87_v24, %v64_v36 }
  0x34   :  { %v79_v39 = vsel %vm20_vm1, %v76_v38, %v78_v37 }
  0x35   :  { %80 = vadd.xlane.f32.xlu0 %v79_v39 }
  0xc2   :  { %v81_v40 = vpop.xlane.xlu0 %80 }
  0xc3   :  { %82 = vst [vmem:[%s126_s2] sm:$0xff] %v81_v40 }

</bundles_post_ra>
